<compile_context>
chip_gen: v6e
topology: v6e:2x2x1
jax: 0.10.0
libtpu: 0.0.40
codegen_flags: <defaults>
</compile_context>

<pallas_src>
import functools
import math

import jax
import jax.numpy as jnp
from jax.experimental import pallas as pl
from jax.experimental.pallas import tpu as pltpu

LN_EPS = 1e-5   # torch.nn.LayerNorm default
LANE = 128
SUBLANE = 8


def _round_up(x, m):
    return (x + m - 1) // m * m


# ---------------------------------------------------------------------------
# Fused kernel: (Linear -> LayerNorm -> Sigmoid) * (L-1)  ->  Linear
# ---------------------------------------------------------------------------
def _fused_mlp_kernel(*refs, real_out_dims):
    """refs = (x_ref, [w,b,g,beta] per hidden layer..., w_last, b_last, o_ref).

    All feature dims are zero-padded to multiples of 128; `real_out_dims` holds the
    true (unpadded) output width of every layer so LayerNorm normalizes correctly.
    Padded weight columns/rows, biases, gammas and betas are zero, so padded lanes
    contribute nothing to any matmul or reduction.
    """
    x_ref = refs[0]
    o_ref = refs[-1]
    p = refs[1:-1]

    n_layers = len(real_out_dims)
    h = x_ref[...].astype(jnp.float32)          # (bm, Din_pad)

    idx = 0
    for li in range(n_layers - 1):              # hidden layers
        w = p[idx][...]                         # (Din_pad, Dout_pad)
        b = p[idx + 1][...]                     # (1, Dout_pad)
        g = p[idx + 2][...]                     # (1, Dout_pad)
        beta = p[idx + 3][...]                  # (1, Dout_pad)
        idx += 4

        y = jnp.dot(h, w, preferred_element_type=jnp.float32) + b   # (bm, Dout_pad)

        # LayerNorm over the real feature width (biased variance, like PyTorch).
        inv_d = 1.0 / float(real_out_dims[li])
        s = jnp.sum(y, axis=-1, keepdims=True)
        ss = jnp.sum(y * y, axis=-1, keepdims=True)
        mean = s * inv_d
        var = jnp.maximum(ss * inv_d - mean * mean, 0.0)
        y = (y - mean) * jax.lax.rsqrt(var + LN_EPS) * g + beta

        h = jax.nn.sigmoid(y)                   # padded lanes -> 0.5, zeroed by next W

    # Final Linear
    w = p[idx][...]
    b = p[idx + 1][...]
    o_ref[...] = (jnp.dot(h, w, preferred_element_type=jnp.float32) + b
                  ).astype(o_ref.dtype)


# ---------------------------------------------------------------------------
# Wrapper
# ---------------------------------------------------------------------------
def prepare_params(params):
    """One-time: transpose W to (Din, Dout) and zero-pad features to 128 lanes.

    Returns a flat list: [w, b, gamma, beta] per hidden layer, then [w, b].
    """
    flat = []
    for p in params:
        w = jnp.asarray(p["w"], jnp.float32)            # torch layout (Dout, Din)
        dout, din = w.shape
        din_p, dout_p = _round_up(din, LANE), _round_up(dout, LANE)

        w_t = jnp.zeros((din_p, dout_p), jnp.float32).at[:din, :dout].set(w.T)
        b = jnp.zeros((1, dout_p), jnp.float32).at[0, :dout].set(
            jnp.asarray(p["b"], jnp.float32).reshape(-1))
        flat += [w_t, b]
        if "gamma" in p:
            g = jnp.zeros((1, dout_p), jnp.float32).at[0, :dout].set(
                jnp.asarray(p["gamma"], jnp.float32).reshape(-1))
            bt = jnp.zeros((1, dout_p), jnp.float32).at[0, :dout].set(
                jnp.asarray(p["beta"], jnp.float32).reshape(-1))
            flat += [g, bt]
    return flat


def make_layernorm_mlp_forward(layer_size):
    n_layers = len(layer_size) - 1
    real_out = tuple(layer_size[1:])
    in_pad = _round_up(layer_size[0], LANE)
    out_pads = tuple(_round_up(d, LANE) for d in real_out)

    kernel = functools.partial(_fused_mlp_kernel, real_out_dims=real_out)

    def forward(x, flat_params):
        B, din = x.shape
        bm = min(128, _round_up(B, SUBLANE))            # batch tile (multiple of 8)
        b_pad = _round_up(B, bm)

        x_p = jnp.zeros((b_pad, in_pad), jnp.float32).at[:B, :din].set(x)

        # Activations tiled over batch; weights / biases fully resident in VMEM.
        in_specs = [pl.BlockSpec((bm, in_pad), lambda i: (i, 0))]
        cur_in = in_pad
        for li in range(n_layers):
            dout_p = out_pads[li]
            in_specs.append(pl.BlockSpec((cur_in, dout_p), lambda i: (0, 0)))  # w
            in_specs.append(pl.BlockSpec((1, dout_p), lambda i: (0, 0)))       # b
            if li < n_layers - 1:
                in_specs.append(pl.BlockSpec((1, dout_p), lambda i: (0, 0)))   # gamma
                in_specs.append(pl.BlockSpec((1, dout_p), lambda i: (0, 0)))   # beta
            cur_in = dout_p

        out_p = pl.pallas_call(
            kernel,
            out_shape=jax.ShapeDtypeStruct((b_pad, out_pads[-1]), jnp.float32),
            grid=(b_pad // bm,),
            in_specs=in_specs,
            out_specs=pl.BlockSpec((bm, out_pads[-1]), lambda i: (i, 0)),
            compiler_params=pltpu.CompilerParams(
                dimension_semantics=("parallel",)),
        )(x_p, *flat_params)

        return out_p[:B, :real_out[-1]]

    return jax.jit(forward)


# ---------------------------------------------------------------------------
# Init (torch-like shapes) and pure-JAX reference
# ---------------------------------------------------------------------------
def init_layernorm_mlp_params(key, layer_size):
    params = []
    n = len(layer_size)
    for i in range(n - 1):
        din, dout = layer_size[i], layer_size[i + 1]
        key, kw, kb = jax.random.split(key, 3)
        bound = 1.0 / math.sqrt(din)
        w = jax.random.uniform(kw, (dout, din), jnp.float32, -bound, bound)
        b = jax.random.uniform(kb, (dout,), jnp.float32, -bound, bound)
        if i < n - 2:   # hidden layer: Linear + LayerNorm + Sigmoid
            params.append(dict(w=w, b=b,
                               gamma=jnp.ones((dout,), jnp.float32),
                               beta=jnp.zeros((dout,), jnp.float32)))
        else:           # final Linear
            params.append(dict(w=w, b=b))
    return params


def _reference_forward(x, params):
    h = x
    for p in params[:-1]:
        y = h @ p["w"].T + p["b"]
        mean = jnp.mean(y, axis=-1, keepdims=True)
        var = jnp.mean((y - mean) ** 2, axis=-1, keepdims=True)
        y = (y - mean) / jnp.sqrt(var + LN_EPS) * p["gamma"] + p["beta"]
        h = jax.nn.sigmoid(y)
    p = params[-1]
    return h @ p["w"].T + p["b"]


# ---------------------------------------------------------------------------
if __name__ == "__main__":
    layer_size = [32, 64, 48, 16]   # two (Linear+LN+Sigmoid) blocks + final Linear
    batch = 8

    key = jax.random.PRNGKey(0)
    key, kx = jax.random.split(key)
    x = jax.random.normal(kx, (batch, layer_size[0]), jnp.float32)

    params = init_layernorm_mlp_params(key, layer_size)
    flat_params = prepare_params(params)                 # one-time transpose + pad

    forward = make_layernorm_mlp_forward(layer_size)
    out = jax.block_until_ready(forward(x, flat_params))

    ref = _reference_forward(x, params)
    assert out.shape == (batch, layer_size[-1])
    assert jnp.allclose(out, ref, atol=1e-5, rtol=1e-5), "mismatch vs reference"

    print("KERNEL_OK")
</pallas_src>

<mosaic_0001>
module attributes {stable_mosaic.version = 11 : i64} {
  func.func @_fused_mlp_kernel(%arg0: i32, %arg1: memref<8x128xf32, #tpu.memory_space<vmem>>, %arg2: memref<128x128xf32, #tpu.memory_space<vmem>>, %arg3: memref<1x128xf32, #tpu.memory_space<vmem>>, %arg4: memref<1x128xf32, #tpu.memory_space<vmem>>, %arg5: memref<1x128xf32, #tpu.memory_space<vmem>>, %arg6: memref<128x128xf32, #tpu.memory_space<vmem>>, %arg7: memref<1x128xf32, #tpu.memory_space<vmem>>, %arg8: memref<1x128xf32, #tpu.memory_space<vmem>>, %arg9: memref<1x128xf32, #tpu.memory_space<vmem>>, %arg10: memref<128x128xf32, #tpu.memory_space<vmem>>, %arg11: memref<1x128xf32, #tpu.memory_space<vmem>>, %arg12: memref<8x128xf32, #tpu.memory_space<vmem>>) attributes {dimension_semantics = [#tpu.dimension_semantics<parallel>], iteration_bounds = array<i64: 1>, scalar_prefetch = 0 : i64, scratch_operands = 0 : i64, tpu.core_type = #tpu.core_type<tc>, window_params = [{transform_indices = @transform_0, window_bounds = array<i64: 8, 128>}, {pipeline_mode = #tpu.pipeline_mode<synchronous>, transform_indices = @transform_1, window_bounds = array<i64: 128, 128>}, {pipeline_mode = #tpu.pipeline_mode<synchronous>, transform_indices = @transform_2, window_bounds = array<i64: 1, 128>}, {pipeline_mode = #tpu.pipeline_mode<synchronous>, transform_indices = @transform_3, window_bounds = array<i64: 1, 128>}, {pipeline_mode = #tpu.pipeline_mode<synchronous>, transform_indices = @transform_4, window_bounds = array<i64: 1, 128>}, {pipeline_mode = #tpu.pipeline_mode<synchronous>, transform_indices = @transform_5, window_bounds = array<i64: 128, 128>}, {pipeline_mode = #tpu.pipeline_mode<synchronous>, transform_indices = @transform_6, window_bounds = array<i64: 1, 128>}, {pipeline_mode = #tpu.pipeline_mode<synchronous>, transform_indices = @transform_7, window_bounds = array<i64: 1, 128>}, {pipeline_mode = #tpu.pipeline_mode<synchronous>, transform_indices = @transform_8, window_bounds = array<i64: 1, 128>}, {pipeline_mode = #tpu.pipeline_mode<synchronous>, transform_indices = @transform_9, window_bounds = array<i64: 128, 128>}, {pipeline_mode = #tpu.pipeline_mode<synchronous>, transform_indices = @transform_10, window_bounds = array<i64: 1, 128>}, {transform_indices = @transform_11, window_bounds = array<i64: 8, 128>}]} {
    %c0 = arith.constant 0 : index
    %c0_0 = arith.constant 0 : index
    %0 = vector.load %arg1[%c0, %c0_0] : memref<8x128xf32, #tpu.memory_space<vmem>>, vector<8x128xf32>
    %c0_1 = arith.constant 0 : index
    %c0_2 = arith.constant 0 : index
    %1 = vector.load %arg2[%c0_1, %c0_2] : memref<128x128xf32, #tpu.memory_space<vmem>>, vector<128x128xf32>
    %c0_3 = arith.constant 0 : index
    %c0_4 = arith.constant 0 : index
    %2 = vector.load %arg3[%c0_3, %c0_4] : memref<1x128xf32, #tpu.memory_space<vmem>>, vector<1x128xf32>
    %c0_5 = arith.constant 0 : index
    %c0_6 = arith.constant 0 : index
    %3 = vector.load %arg4[%c0_5, %c0_6] : memref<1x128xf32, #tpu.memory_space<vmem>>, vector<1x128xf32>
    %c0_7 = arith.constant 0 : index
    %c0_8 = arith.constant 0 : index
    %4 = vector.load %arg5[%c0_7, %c0_8] : memref<1x128xf32, #tpu.memory_space<vmem>>, vector<1x128xf32>
    %cst = arith.constant dense<0.000000e+00> : vector<8x128xf32>
    %5 = tpu.matmul %0, %1, %cst {dimension_numbers = #tpu.dot_dimension_numbers<[1], [0], [0], [1], [0, 0, 1, 1], [], []>} : vector<8x128xf32>, vector<128x128xf32>, vector<8x128xf32> -> vector<8x128xf32>
    %6 = vector.broadcast %2 : vector<1x128xf32> to vector<8x128xf32>
    %7 = arith.addf %5, %6 : vector<8x128xf32>
    %cst_9 = arith.constant dense<0.000000e+00> : vector<8xf32>
    %8 = vector.multi_reduction <add>, %7, %cst_9 [1] : vector<8x128xf32> to vector<8xf32>
    %9 = vector.shape_cast %8 : vector<8xf32> to vector<8x1xf32>
    %10 = arith.mulf %7, %7 : vector<8x128xf32>
    %cst_10 = arith.constant dense<0.000000e+00> : vector<8xf32>
    %11 = vector.multi_reduction <add>, %10, %cst_10 [1] : vector<8x128xf32> to vector<8xf32>
    %12 = vector.shape_cast %11 : vector<8xf32> to vector<8x1xf32>
    %cst_11 = arith.constant 1.562500e-02 : f32
    %13 = vector.broadcast %cst_11 : f32 to vector<8x1xf32>
    %14 = arith.mulf %9, %13 : vector<8x1xf32>
    %cst_12 = arith.constant 1.562500e-02 : f32
    %15 = vector.broadcast %cst_12 : f32 to vector<8x1xf32>
    %16 = arith.mulf %12, %15 : vector<8x1xf32>
    %17 = arith.mulf %14, %14 : vector<8x1xf32>
    %18 = arith.subf %16, %17 : vector<8x1xf32>
    %cst_13 = arith.constant 0.000000e+00 : f32
    %19 = vector.broadcast %cst_13 : f32 to vector<8x1xf32>
    %20 = arith.maximumf %18, %19 : vector<8x1xf32>
    %21 = vector.broadcast %14 : vector<8x1xf32> to vector<8x128xf32>
    %22 = arith.subf %7, %21 : vector<8x128xf32>
    %cst_14 = arith.constant 9.99999974E-6 : f32
    %23 = vector.broadcast %cst_14 : f32 to vector<8x1xf32>
    %24 = arith.addf %20, %23 : vector<8x1xf32>
    %25 = math.rsqrt %24 : vector<8x1xf32>
    %26 = vector.broadcast %25 : vector<8x1xf32> to vector<8x128xf32>
    %27 = arith.mulf %22, %26 : vector<8x128xf32>
    %28 = vector.broadcast %3 : vector<1x128xf32> to vector<8x128xf32>
    %29 = arith.mulf %27, %28 : vector<8x128xf32>
    %30 = vector.broadcast %4 : vector<1x128xf32> to vector<8x128xf32>
    %31 = arith.addf %29, %30 : vector<8x128xf32>
    %32 = arith.negf %31 : vector<8x128xf32>
    %33 = math.exp %32 : vector<8x128xf32>
    %cst_15 = arith.constant 1.000000e+00 : f32
    %34 = vector.broadcast %cst_15 : f32 to vector<8x128xf32>
    %35 = arith.addf %34, %33 : vector<8x128xf32>
    %36 = arith.divf %34, %35 : vector<8x128xf32>
    %c0_16 = arith.constant 0 : index
    %c0_17 = arith.constant 0 : index
    %37 = vector.load %arg6[%c0_16, %c0_17] : memref<128x128xf32, #tpu.memory_space<vmem>>, vector<128x128xf32>
    %c0_18 = arith.constant 0 : index
    %c0_19 = arith.constant 0 : index
    %38 = vector.load %arg7[%c0_18, %c0_19] : memref<1x128xf32, #tpu.memory_space<vmem>>, vector<1x128xf32>
    %c0_20 = arith.constant 0 : index
    %c0_21 = arith.constant 0 : index
    %39 = vector.load %arg8[%c0_20, %c0_21] : memref<1x128xf32, #tpu.memory_space<vmem>>, vector<1x128xf32>
    %c0_22 = arith.constant 0 : index
    %c0_23 = arith.constant 0 : index
    %40 = vector.load %arg9[%c0_22, %c0_23] : memref<1x128xf32, #tpu.memory_space<vmem>>, vector<1x128xf32>
    %cst_24 = arith.constant dense<0.000000e+00> : vector<8x128xf32>
    %41 = tpu.matmul %36, %37, %cst_24 {dimension_numbers = #tpu.dot_dimension_numbers<[1], [0], [0], [1], [0, 0, 1, 1], [], []>} : vector<8x128xf32>, vector<128x128xf32>, vector<8x128xf32> -> vector<8x128xf32>
    %42 = vector.broadcast %38 : vector<1x128xf32> to vector<8x128xf32>
    %43 = arith.addf %41, %42 : vector<8x128xf32>
    %cst_25 = arith.constant dense<0.000000e+00> : vector<8xf32>
    %44 = vector.multi_reduction <add>, %43, %cst_25 [1] : vector<8x128xf32> to vector<8xf32>
    %45 = vector.shape_cast %44 : vector<8xf32> to vector<8x1xf32>
    %46 = arith.mulf %43, %43 : vector<8x128xf32>
    %cst_26 = arith.constant dense<0.000000e+00> : vector<8xf32>
    %47 = vector.multi_reduction <add>, %46, %cst_26 [1] : vector<8x128xf32> to vector<8xf32>
    %48 = vector.shape_cast %47 : vector<8xf32> to vector<8x1xf32>
    %cst_27 = arith.constant 0.020833334 : f32
    %49 = vector.broadcast %cst_27 : f32 to vector<8x1xf32>
    %50 = arith.mulf %45, %49 : vector<8x1xf32>
    %cst_28 = arith.constant 0.020833334 : f32
    %51 = vector.broadcast %cst_28 : f32 to vector<8x1xf32>
    %52 = arith.mulf %48, %51 : vector<8x1xf32>
    %53 = arith.mulf %50, %50 : vector<8x1xf32>
    %54 = arith.subf %52, %53 : vector<8x1xf32>
    %cst_29 = arith.constant 0.000000e+00 : f32
    %55 = vector.broadcast %cst_29 : f32 to vector<8x1xf32>
    %56 = arith.maximumf %54, %55 : vector<8x1xf32>
    %57 = vector.broadcast %50 : vector<8x1xf32> to vector<8x128xf32>
    %58 = arith.subf %43, %57 : vector<8x128xf32>
    %cst_30 = arith.constant 9.99999974E-6 : f32
    %59 = vector.broadcast %cst_30 : f32 to vector<8x1xf32>
    %60 = arith.addf %56, %59 : vector<8x1xf32>
    %61 = math.rsqrt %60 : vector<8x1xf32>
    %62 = vector.broadcast %61 : vector<8x1xf32> to vector<8x128xf32>
    %63 = arith.mulf %58, %62 : vector<8x128xf32>
    %64 = vector.broadcast %39 : vector<1x128xf32> to vector<8x128xf32>
    %65 = arith.mulf %63, %64 : vector<8x128xf32>
    %66 = vector.broadcast %40 : vector<1x128xf32> to vector<8x128xf32>
    %67 = arith.addf %65, %66 : vector<8x128xf32>
    %68 = arith.negf %67 : vector<8x128xf32>
    %69 = math.exp %68 : vector<8x128xf32>
    %cst_31 = arith.constant 1.000000e+00 : f32
    %70 = vector.broadcast %cst_31 : f32 to vector<8x128xf32>
    %71 = arith.addf %70, %69 : vector<8x128xf32>
    %72 = arith.divf %70, %71 : vector<8x128xf32>
    %c0_32 = arith.constant 0 : index
    %c0_33 = arith.constant 0 : index
    %73 = vector.load %arg10[%c0_32, %c0_33] : memref<128x128xf32, #tpu.memory_space<vmem>>, vector<128x128xf32>
    %c0_34 = arith.constant 0 : index
    %c0_35 = arith.constant 0 : index
    %74 = vector.load %arg11[%c0_34, %c0_35] : memref<1x128xf32, #tpu.memory_space<vmem>>, vector<1x128xf32>
    %cst_36 = arith.constant dense<0.000000e+00> : vector<8x128xf32>
    %75 = tpu.matmul %72, %73, %cst_36 {dimension_numbers = #tpu.dot_dimension_numbers<[1], [0], [0], [1], [0, 0, 1, 1], [], []>} : vector<8x128xf32>, vector<128x128xf32>, vector<8x128xf32> -> vector<8x128xf32>
    %76 = vector.broadcast %74 : vector<1x128xf32> to vector<8x128xf32>
    %77 = arith.addf %75, %76 : vector<8x128xf32>
    %c0_37 = arith.constant 0 : index
    %c0_38 = arith.constant 0 : index
    %78 = vector.load %arg12[%c0_37, %c0_38] : memref<8x128xf32, #tpu.memory_space<vmem>>, vector<8x128xf32>
    tpu.vector_store %arg12[%c0_37, %c0_38], %77 {strides = array<i32>} : memref<8x128xf32, #tpu.memory_space<vmem>>, vector<8x128xf32>,
    return
  }
  func.func @transform_0(%arg0: i32) -> (i32, i32) {
    %c0_i32 = arith.constant 0 : i32
    %c0_i32_0 = arith.constant 0 : i32
    return %arg0, %c0_i32 : i32, i32
  }
  func.func @transform_1(%arg0: i32) -> (i32, i32) {
    %c0_i32 = arith.constant 0 : i32
    %c0_i32_0 = arith.constant 0 : i32
    %c0_i32_1 = arith.constant 0 : i32
    return %c0_i32, %c0_i32_0 : i32, i32
  }
  func.func @transform_2(%arg0: i32) -> (i32, i32) {
    %c0_i32 = arith.constant 0 : i32
    %c0_i32_0 = arith.constant 0 : i32
    %c0_i32_1 = arith.constant 0 : i32
    return %c0_i32, %c0_i32_0 : i32, i32
  }
  func.func @transform_3(%arg0: i32) -> (i32, i32) {
    %c0_i32 = arith.constant 0 : i32
    %c0_i32_0 = arith.constant 0 : i32
    %c0_i32_1 = arith.constant 0 : i32
    return %c0_i32, %c0_i32_0 : i32, i32
  }
  func.func @transform_4(%arg0: i32) -> (i32, i32) {
    %c0_i32 = arith.constant 0 : i32
    %c0_i32_0 = arith.constant 0 : i32
    %c0_i32_1 = arith.constant 0 : i32
    return %c0_i32, %c0_i32_0 : i32, i32
  }
  func.func @transform_5(%arg0: i32) -> (i32, i32) {
    %c0_i32 = arith.constant 0 : i32
    %c0_i32_0 = arith.constant 0 : i32
    %c0_i32_1 = arith.constant 0 : i32
    return %c0_i32, %c0_i32_0 : i32, i32
  }
  func.func @transform_6(%arg0: i32) -> (i32, i32) {
    %c0_i32 = arith.constant 0 : i32
    %c0_i32_0 = arith.constant 0 : i32
    %c0_i32_1 = arith.constant 0 : i32
    return %c0_i32, %c0_i32_0 : i32, i32
  }
  func.func @transform_7(%arg0: i32) -> (i32, i32) {
    %c0_i32 = arith.constant 0 : i32
    %c0_i32_0 = arith.constant 0 : i32
    %c0_i32_1 = arith.constant 0 : i32
    return %c0_i32, %c0_i32_0 : i32, i32
  }
  func.func @transform_8(%arg0: i32) -> (i32, i32) {
    %c0_i32 = arith.constant 0 : i32
    %c0_i32_0 = arith.constant 0 : i32
    %c0_i32_1 = arith.constant 0 : i32
    return %c0_i32, %c0_i32_0 : i32, i32
  }
  func.func @transform_9(%arg0: i32) -> (i32, i32) {
    %c0_i32 = arith.constant 0 : i32
    %c0_i32_0 = arith.constant 0 : i32
    %c0_i32_1 = arith.constant 0 : i32
    return %c0_i32, %c0_i32_0 : i32, i32
  }
  func.func @transform_10(%arg0: i32) -> (i32, i32) {
    %c0_i32 = arith.constant 0 : i32
    %c0_i32_0 = arith.constant 0 : i32
    %c0_i32_1 = arith.constant 0 : i32
    return %c0_i32, %c0_i32_0 : i32, i32
  }
  func.func @transform_11(%arg0: i32) -> (i32, i32) {
    %c0_i32 = arith.constant 0 : i32
    %c0_i32_0 = arith.constant 0 : i32
    return %arg0, %c0_i32 : i32, i32
  }
}

</mosaic_0001>

<bundles_post_ra>
// kernel: forward.1
= control target key start
LH: loop header
LB: loop body
LE: loop exit
PB: predicated region body
PF: predicated region fallthrough
CT: control target
= control target key end

     0   :  { %16 = vsyncpa [#allocation3], 0  ;;  %s890_s0 = inlined_call_operand.vmem [shape: f32[8,128], index: 0, kind: input, shape index: {}]   ;;  %s891_s1 = inlined_call_operand.hbm [shape: f32[128,128], index: 1, kind: input, shape index: {}]   ;;  %s892_s2 = inlined_call_operand.vmem [shape: f32[1,128], index: 2, kind: input, shape index: {}]   ;;  %s893_s3 = inlined_call_operand.vmem [shape: f32[1,128], index: 3, kind: input, shape index: {}]   ;;  %s894_s4 = inlined_call_operand.vmem [shape: f32[1,128], index: 4, kind: input, shape index: {}]   ;;  %s895_s5 = inlined_call_operand.hbm [shape: f32[128,128], index: 5, kind: input, shape index: {}]   ;;  %s896_s6 = inlined_call_operand.vmem [shape: f32[1,128], index: 6, kind: input, shape index: {}]   ;;  %s897_s7 = inlined_call_operand.vmem [shape: f32[1,128], index: 7, kind: input, shape index: {}]   ;;  %s898_s8 = inlined_call_operand.vmem [shape: f32[1,128], index: 8, kind: input, shape index: {}]   ;;  %s899_s9 = inlined_call_operand.hbm [shape: f32[128,128], index: 9, kind: input, shape index: {}]   ;;  %s900_s10 = inlined_call_operand.vmem [shape: f32[1,128], index: 10, kind: input, shape index: {}]   ;;  %s901_s11 = inlined_call_operand.hbm [shape: f32[8,128], index: 11, kind: output, shape index: {}]  }
   0x1   :  { %17 = vsyncpa [#allocation6], 0 }
   0x2   :  { %18 = vsyncpa [#allocation4], 0  ;;  %s720_s17 = smov [#allocation5]   ;;  %s721_s19 = smov [#allocation2]  }
   0x3   :  { %s44_s18 = sshll.u32 %s720_s17, 4  ;;  %s26_s20 = sshll.u32 %s721_s19, 4  ;;  %s45_s18 = int_to_ptr.vmem [resolvable:$true] %s44_s18  ;;  %s27_s20 = int_to_ptr.vmem [resolvable:$true] %s26_s20 }
   0x4   :  { %s642_s21 = scalar_lea.vmem %s45_s18, 2048  ;;  %p647_p1 = scmp.lt.s32.totalorder %s45_s18, %s45_s18 }
   0x5   :  { %p643_p0 = scmp.ne.s32.totalorder %s45_s18, %s642_s21  ;;  %p648_p2 = scmp.lt.s32.totalorder %s642_s21, %s642_s21 }
   0x7   :  { %p649_p3 = por %p648_p2, %p647_p1 }
   0x9   :  { %p650_p4 = pnand %p649_p3, %p643_p0 }
   0xb   :  { %653 = shalt.err (!%p650_p4)
}
   0xc   :  { %s722_s22 = smov 128   ;;  %s723_s23 = smov 8  }
   0xd   :  { %50 = dma.hbm_to_vmem [thread:$0]  %s895_s5, 2048, %s45_s18, [#allocation6], %s722_s22, %s722_s22, %s723_s23  }
   0xe   :  { %s662_s26 = scalar_lea.vmem %s27_s20, 2048  ;;  %p667_p6 = scmp.lt.s32.totalorder %s27_s20, %s27_s20 }
   0xf   :  { %p663_p5 = scmp.ne.s32.totalorder %s27_s20, %s662_s26  ;;  %p668_p7 = scmp.lt.s32.totalorder %s662_s26, %s662_s26 }
  0x11   :  { %p669_p8 = por %p668_p7, %p667_p6 }
  0x13   :  { %p670_p9 = pnand %p669_p8, %p663_p5 }
  0x15   :  { %673 = shalt.err (!%p670_p9)
}
  0x16   :  { %32 = dma.hbm_to_vmem [thread:$0]  %s891_s1, 2048, %s27_s20, [#allocation3], %s722_s22, %s722_s22, %s723_s23  }
  0x17   :  { %s724_s29 = smov [#allocation7]  }
  0x18   :  { %s62_s30 = sshll.u32 %s724_s29, 4  ;;  %s63_s30 = int_to_ptr.vmem [resolvable:$true] %s62_s30 }
  0x19   :  { %s682_s12 = scalar_lea.vmem %s63_s30, 2048  ;;  %p687_p11 = scmp.lt.s32.totalorder %s63_s30, %s63_s30 }
  0x1a   :  { %p683_p10 = scmp.ne.s32.totalorder %s63_s30, %s682_s12  ;;  %p688_p12 = scmp.lt.s32.totalorder %s682_s12, %s682_s12 }
  0x1c   :  { %p689_p13 = por %p688_p12, %p687_p11 }
  0x1e   :  { %p690_p0 = pnand %p689_p13, %p683_p10 }
  0x20   :  { %693 = shalt.err (!%p690_p0)
}
  0x21   :  { %68 = dma.hbm_to_vmem [thread:$0]  %s899_s9, 2048, %s63_s30, [#allocation6], %s722_s22, %s722_s22, %s723_s23  }
  0x22   :  { %714 = dma.done.wait [#allocation3], 2048  }
  0x23   :  { %715 = vsyncadd [#allocation3], 4294965248 }
  0x24   :  { %716 = dma.done.wait [#allocation6], 4096  }
  0x25   :  { %717 = vsyncadd [#allocation6], 4294963200  ;;  %v725_v0 = vmov 0.0   ;;  %vm726_vm0 = vmmov 0   ;;  %v96_v1 = vld [vmem:[#allocation2 + $0x78] sm:$0xff]  ;;  %v95_v2 = vld [vmem:[#allocation2 + $0x70] sm:$0xff] }
  0x26   :  { %509 = vmatprep.subr.mxu0 %v725_v0  ;;  %541 = vmatprep.mubr.msk.f32.mxu0 %vm726_vm0, %v725_v0  ;;  %v94_v3 = vld [vmem:[#allocation2 + $0x68] sm:$0xff]  ;;  %v93_v4 = vld [vmem:[#allocation2 + $0x60] sm:$0xff]  ;;  %v92_v5 = vld [vmem:[#allocation2 + $0x58] sm:$0xff]  ;;  %s727_s23 = smov [#allocation8]  }
  0x27   :  { %544 = vmatprep.subr.mxu1 %v725_v0  ;;  %576 = vmatprep.mubr.msk.f32.mxu1 %vm726_vm0, %v725_v0  ;;  %v91_v6 = vld [vmem:[#allocation2 + $0x50] sm:$0xff]  ;;  %v90_v7 = vld [vmem:[#allocation2 + $0x48] sm:$0xff]  ;;  %v89_v8 = vld [vmem:[#allocation2 + $0x40] sm:$0xff] }
  0x28   :  { %510 = vmatpush3.msra.mxu0 %v96_v1  ;;  %v88_v9 = vld [vmem:[#allocation2 + $0x38] sm:$0xff]  ;;  %v87_v10 = vld [vmem:[#allocation2 + $0x30] sm:$0xff]  ;;  %v86_v11 = vld [vmem:[#allocation2 + $0x28] sm:$0xff] }
  0x29   :  { %511 = vmatprep.subr.mxu0 %v725_v0  ;;  %v85_v12 = vld [vmem:[#allocation2 + $0x20] sm:$0xff]  ;;  %v84_v13 = vld [vmem:[#allocation2 + $0x18] sm:$0xff]  ;;  %v83_v14 = vld [vmem:[#allocation2 + $0x10] sm:$0xff] }
  0x2a   :  { %512 = vmatpush3.msra.mxu0 %v95_v2  ;;  %v82_v15 = vld [vmem:[#allocation2 + $0x8] sm:$0xff]  ;;  %v81_v16 = vld [vmem:[#allocation2] sm:$0xff]  ;;  %v225_v23 = vld [vmem:[#allocation5 + $0x78] sm:$0xff] }
  0x2b   :  { %513 = vmatprep.subr.mxu0 %v725_v0  ;;  %v80_v17 = vld [vmem:[%s890_s0] sm:$0xff]  ;;  %545 = vmatpush3.msra.mxu1 %v225_v23  ;;  %v224_v24 = vld [vmem:[#allocation5 + $0x70] sm:$0xff]  ;;  %v223_v25 = vld [vmem:[#allocation5 + $0x68] sm:$0xff] }
  0x2c   :  { %514 = vmatpush3.msra.mxu0 %v94_v3  ;;  %v449_v18 = vld [vmem:[%s892_s2] ss:$0 sm:$0xff]  ;;  %546 = vmatprep.subr.mxu1 %v725_v0  ;;  %v221_v27 = vld [vmem:[#allocation5 + $0x58] sm:$0xff]  ;;  %v220_v28 = vld [vmem:[#allocation5 + $0x50] sm:$0xff] }
  0x2d   :  { %515 = vmatprep.subr.mxu0 %v725_v0  ;;  %547 = vmatpush3.msra.mxu1 %v224_v24  ;;  %v222_v26 = vld [vmem:[#allocation5 + $0x60] sm:$0xff]  ;;  %v219_v29 = vld [vmem:[#allocation5 + $0x48] sm:$0xff]  ;;  %v217_v31 = vld [vmem:[#allocation5 + $0x38] sm:$0xff] }
  0x2e   :  { %516 = vmatpush3.msra.mxu0 %v93_v4  ;;  %548 = vmatprep.subr.mxu1 %v725_v0  ;;  %v218_v30 = vld [vmem:[#allocation5 + $0x40] sm:$0xff]  ;;  %v216_v32 = vld [vmem:[#allocation5 + $0x30] sm:$0xff]  ;;  %v215_v33 = vld [vmem:[#allocation5 + $0x28] sm:$0xff] }
  0x2f   :  { %517 = vmatprep.subr.mxu0 %v725_v0  ;;  %549 = vmatpush3.msra.mxu1 %v223_v25  ;;  %v214_v34 = vld [vmem:[#allocation5 + $0x20] sm:$0xff]  ;;  %v213_v35 = vld [vmem:[#allocation5 + $0x18] sm:$0xff]  ;;  %v212_v36 = vld [vmem:[#allocation5 + $0x10] sm:$0xff] }
  0x30   :  { %518 = vmatpush3.msra.mxu0 %v92_v5  ;;  %550 = vmatprep.subr.mxu1 %v725_v0  ;;  %v211_v37 = vld [vmem:[#allocation5 + $0x8] sm:$0xff]  ;;  %v210_v38 = vld [vmem:[#allocation5] sm:$0xff]  ;;  %v354_v63 = vld [vmem:[#allocation7 + $0x78] sm:$0xff] }
  0x31   :  { %519 = vmatprep.subr.mxu0 %v725_v0  ;;  %551 = vmatpush3.msra.mxu1 %v222_v26  ;;  %v450_v49 = vld [vmem:[%s893_s3] ss:$0 sm:$0xff]  ;;  %v353_v1 = vld [vmem:[#allocation7 + $0x70] sm:$0xff]  ;;  %v352_v2 = vld [vmem:[#allocation7 + $0x68] sm:$0xff] }
  0x32   :  { %520 = vmatpush3.msra.mxu0 %v91_v6  ;;  %552 = vmatprep.subr.mxu1 %v725_v0  ;;  %v451_v51 = vld [vmem:[%s894_s4] ss:$0 sm:$0xff]  ;;  %v350_v4 = vld [vmem:[#allocation7 + $0x58] sm:$0xff]  ;;  %v349_v5 = vld [vmem:[#allocation7 + $0x50] sm:$0xff] }
  0x33   :  { %521 = vmatprep.subr.mxu0 %v725_v0  ;;  %553 = vmatpush3.msra.mxu1 %v221_v27  ;;  %v453_v58 = vld [vmem:[%s896_s6] ss:$0 sm:$0xff]  ;;  %v348_v6 = vld [vmem:[#allocation7 + $0x48] sm:$0xff] }
  0x34   :  { %522 = vmatpush3.msra.mxu0 %v90_v7  ;;  %554 = vmatprep.subr.mxu1 %v725_v0  ;;  %v351_v3 = vld [vmem:[#allocation7 + $0x60] sm:$0xff] }
  0x35   :  { %523 = vmatprep.subr.mxu0 %v725_v0  ;;  %555 = vmatpush3.msra.mxu1 %v220_v28  ;;  %v347_v7 = vld [vmem:[#allocation7 + $0x40] sm:$0xff] }
  0x36   :  { %524 = vmatpush3.msra.mxu0 %v89_v8  ;;  %556 = vmatprep.subr.mxu1 %v725_v0  ;;  %v346_v8 = vld [vmem:[#allocation7 + $0x38] sm:$0xff]  ;;  %v454_v26 = vld [vmem:[%s897_s7] ss:$0 sm:$0xff]  ;;  %s439_s7 = sshll.u32 %s727_s23, 4  ;;  %s440_s7 = int_to_ptr.vmem [resolvable:$true] %s439_s7 }
  0x37   :  { %525 = vmatprep.subr.mxu0 %v725_v0  ;;  %557 = vmatpush3.msra.mxu1 %v219_v29  ;;  %p699_p2 = scmp.lt.s32.totalorder %s440_s7, %s440_s7 }
  0x38   :  { %526 = vmatpush3.msra.mxu0 %v88_v9  ;;  %558 = vmatprep.subr.mxu1 %v725_v0  ;;  %v345_v9 = vld [vmem:[#allocation7 + $0x30] sm:$0xff] }
  0x39   :  { %527 = vmatprep.subr.mxu0 %v725_v0  ;;  %559 = vmatpush3.msra.mxu1 %v218_v30 }
  0x3a   :  { %528 = vmatpush3.msra.mxu0 %v87_v10  ;;  %560 = vmatprep.subr.mxu1 %v725_v0  ;;  %v344_v10 = vld [vmem:[#allocation7 + $0x28] sm:$0xff] }
  0x3b   :  { %529 = vmatprep.subr.mxu0 %v725_v0  ;;  %561 = vmatpush3.msra.mxu1 %v217_v31 }
  0x3c   :  { %530 = vmatpush3.msra.mxu0 %v86_v11  ;;  %562 = vmatprep.subr.mxu1 %v725_v0  ;;  %v343_v11 = vld [vmem:[#allocation7 + $0x20] sm:$0xff] }
  0x3d   :  { %531 = vmatprep.subr.mxu0 %v725_v0  ;;  %563 = vmatpush3.msra.mxu1 %v216_v32 }
  0x3e   :  { %532 = vmatpush3.msra.mxu0 %v85_v12  ;;  %564 = vmatprep.subr.mxu1 %v725_v0  ;;  %v342_v12 = vld [vmem:[#allocation7 + $0x18] sm:$0xff] }
  0x3f   :  { %533 = vmatprep.subr.mxu0 %v725_v0  ;;  %565 = vmatpush3.msra.mxu1 %v215_v33 }
  0x40   :  { %534 = vmatpush3.msra.mxu0 %v84_v13  ;;  %566 = vmatprep.subr.mxu1 %v725_v0  ;;  %v341_v13 = vld [vmem:[#allocation7 + $0x10] sm:$0xff] }
  0x41   :  { %535 = vmatprep.subr.mxu0 %v725_v0  ;;  %567 = vmatpush3.msra.mxu1 %v214_v34  ;;  %v457_v34 = vld [vmem:[%s900_s10] ss:$0 sm:$0xff] }
  0x42   :  { %536 = vmatpush3.msra.mxu0 %v83_v14  ;;  %568 = vmatprep.subr.mxu1 %v725_v0  ;;  %v340_v14 = vld [vmem:[#allocation7 + $0x8] sm:$0xff] }
  0x43   :  { %537 = vmatprep.subr.mxu0 %v725_v0  ;;  %569 = vmatpush3.msra.mxu1 %v213_v35 }
  0x44   :  { %538 = vmatpush3.msra.mxu0 %v82_v15  ;;  %570 = vmatprep.subr.mxu1 %v725_v0  ;;  %v339_v15 = vld [vmem:[#allocation7] sm:$0xff] }
  0x45   :  { %539 = vmatprep.subr.mxu0 %v725_v0  ;;  %571 = vmatpush3.msra.mxu1 %v212_v36 }
  0x46   :  { %540 = vmatpush3.msra.mxu0 %v81_v16  ;;  %572 = vmatprep.subr.mxu1 %v725_v0 }
  0x47   :  { %542 = vmatmul.mubr.f32.vlgmr.msra.gmra.mxu0 %v80_v17  ;;  %579 = vmatprep.subr.mxu0 %v725_v0 }
  0x48   :  { %611 = vmatprep.mubr.msk.f32.mxu0 %vm726_vm0, %v725_v0  ;;  %573 = vmatpush3.msra.mxu1 %v211_v37 }
  0x49   :  { %574 = vmatprep.subr.mxu1 %v725_v0  ;;  %580 = vmatpush3.msra.mxu0 %v354_v63 }
  0x4a   :  { %575 = vmatpush3.msra.mxu1 %v210_v38  ;;  %581 = vmatprep.subr.mxu0 %v725_v0 }
  0x4b   :  { %582 = vmatpush3.msra.mxu0 %v353_v1 }
  0x4c   :  { %583 = vmatprep.subr.mxu0 %v725_v0 }
  0x4d   :  { %584 = vmatpush3.msra.mxu0 %v352_v2 }
  0x4e   :  { %585 = vmatprep.subr.mxu0 %v725_v0 }
  0x4f   :  { %586 = vmatpush3.msra.mxu0 %v351_v3 }
  0x50   :  { %587 = vmatprep.subr.mxu0 %v725_v0 }
  0x51   :  { %588 = vmatpush3.msra.mxu0 %v350_v4 }
  0x52   :  { %589 = vmatprep.subr.mxu0 %v725_v0 }
  0x53   :  { %590 = vmatpush3.msra.mxu0 %v349_v5 }
  0x54   :  { %591 = vmatprep.subr.mxu0 %v725_v0 }
  0x55   :  { %592 = vmatpush3.msra.mxu0 %v348_v6 }
  0x56   :  { %593 = vmatprep.subr.mxu0 %v725_v0 }
  0x57   :  { %594 = vmatpush3.msra.mxu0 %v347_v7 }
  0x58   :  { %595 = vmatprep.subr.mxu0 %v725_v0 }
  0x59   :  { %596 = vmatpush3.msra.mxu0 %v346_v8 }
  0x5a   :  { %597 = vmatprep.subr.mxu0 %v725_v0 }
  0x5b   :  { %598 = vmatpush3.msra.mxu0 %v345_v9 }
  0x5c   :  { %599 = vmatprep.subr.mxu0 %v725_v0 }
  0x5d   :  { %600 = vmatpush3.msra.mxu0 %v344_v10 }
  0x5e   :  { %601 = vmatprep.subr.mxu0 %v725_v0 }
  0x5f   :  { %602 = vmatpush3.msra.mxu0 %v343_v11 }
  0x60   :  { %603 = vmatprep.subr.mxu0 %v725_v0 }
  0x61   :  { %604 = vmatpush3.msra.mxu0 %v342_v12 }
  0x62   :  { %605 = vmatprep.subr.mxu0 %v725_v0 }
  0x63   :  { %606 = vmatpush3.msra.mxu0 %v341_v13 }
  0x64   :  { %607 = vmatprep.subr.mxu0 %v725_v0 }
  0x65   :  { %608 = vmatpush3.msra.mxu0 %v340_v14 }
  0x66   :  { %609 = vmatprep.subr.mxu0 %v725_v0  ;;  %v455_v0 = vld [vmem:[%s898_s8] ss:$0 sm:$0xff]  ;;  %s694_s8 = scalar_lea.vmem %s440_s7, 128 }
  0x67   :  { %610 = vmatpush3.msra.mxu0 %v339_v15  ;;  %p695_p1 = scmp.ne.s32.totalorder %s440_s7, %s694_s8  ;;  %p700_p3 = scmp.lt.s32.totalorder %s694_s8, %s694_s8 }
  0x69   :  { %p701_p4 = por %p700_p3, %p699_p2 }
  0x6b   :  { %p702_p5 = pnand %p701_p4, %p695_p1 }
 0x107   :  { %v172_v19 = vpop.f32.mrf.mxu0 }
 0x108   :  { %v827_v20 = vadd.f32 %v449_v18, %v172_v19 }
 0x109   :  { %v543_v21 = vpop.f32.mrf.mxu0 }
 0x10a   :  { %176 = vadd.xlane.f32.xlu0 %v827_v20  ;;  %v178_v22 = vmul.f32 %v827_v20, %v827_v20 }
 0x10e   :  { %179 = vadd.xlane.f32.xlu0 %v178_v22 }
 0x193   :  { %v177_v39 = vpop.xlane.xlu0 %176 }
 0x194   :  { %v181_v40 = vmul.f32 0.015625, %v177_v39 }
 0x196   :  { %v183_v42 = vmul.f32 %v181_v40, %v181_v40  ;;  %v186_v47 = vsub.f32 %v827_v20, %v181_v40 }
 0x197   :  { %v180_v41 = vpop.xlane.xlu0 %179 }
 0x198   :  { %v182_v43 = vmul.f32 0.015625, %v180_v41 }
 0x19a   :  { %v184_v44 = vsub.f32 %v182_v43, %v183_v42 }
 0x19c   :  { %v185_v45 = vmax.f32 %v184_v44, 0.0 }
 0x19e   :  { %v187_v46 = vadd.f32 1e-05, %v185_v45 }
 0x1a0   :  { %622 = vrsqrt.f32 %v187_v46 }
 0x1ad   :  { %v623_v48 = vpop.eup %622 }
 0x1ae   :  { %v189_v50 = vmul.f32 %v623_v48, %v186_v47 }
 0x1b0   :  { %v196_v52 = vmul.f32 %v450_v49, %v189_v50 }
 0x1b2   :  { %v203_v53 = vadd.f32 %v451_v51, %v196_v52 }
 0x1b4   :  { %v452_v54 = vmul.f32 -1.442695, %v203_v53 }
 0x1b6   :  { %624 = vpow2.f32 %v452_v54 }
 0x1c3   :  { %v625_v55 = vpop.eup %624 }
 0x1c4   :  { %v207_v56 = vadd.f32 1.0, %v625_v55 }
 0x1c6   :  { %626 = vrcp.f32 %v207_v56 }
 0x1d3   :  { %v627_v57 = vpop.eup %626 }
 0x1d4   :  { %577 = vmatmul.mubr.f32.vlgmr.msra.gmra.mxu1 %v627_v57 }
 0x294   :  { %v301_v59 = vpop.f32.mrf.mxu1 }
 0x295   :  { %v857_v60 = vadd.f32 %v453_v58, %v301_v59 }
 0x296   :  { %v578_v61 = vpop.f32.mrf.mxu1 }
 0x297   :  { %305 = vadd.xlane.f32.xlu1 %v857_v60  ;;  %v307_v62 = vmul.f32 %v857_v60, %v857_v60 }
 0x29b   :  { %308 = vadd.xlane.f32.xlu1 %v307_v62 }
 0x320   :  { %v306_v16 = vpop.xlane.xlu1 %305 }
 0x321   :  { %v310_v17 = vmul.f32 0.020833334, %v306_v16 }
 0x323   :  { %v312_v19 = vmul.f32 %v310_v17, %v310_v17  ;;  %v315_v24 = vsub.f32 %v857_v60, %v310_v17 }
 0x324   :  { %v309_v18 = vpop.xlane.xlu1 %308 }
 0x325   :  { %v311_v20 = vmul.f32 0.020833334, %v309_v18 }
 0x327   :  { %v313_v21 = vsub.f32 %v311_v20, %v312_v19 }
 0x329   :  { %v314_v22 = vmax.f32 %v313_v21, 0.0 }
 0x32b   :  { %v316_v23 = vadd.f32 1e-05, %v314_v22 }
 0x32d   :  { %628 = vrsqrt.f32 %v316_v23 }
 0x33a   :  { %v629_v25 = vpop.eup %628 }
 0x33b   :  { %v318_v27 = vmul.f32 %v629_v25, %v315_v24 }
 0x33d   :  { %v325_v28 = vmul.f32 %v454_v26, %v318_v27 }
 0x33f   :  { %v332_v29 = vadd.f32 %v455_v0, %v325_v28 }
 0x341   :  { %v456_v30 = vmul.f32 -1.442695, %v332_v29 }
 0x343   :  { %630 = vpow2.f32 %v456_v30 }
 0x350   :  { %v631_v31 = vpop.eup %630 }
 0x351   :  { %v336_v32 = vadd.f32 1.0, %v631_v31 }
 0x353   :  { %632 = vrcp.f32 %v336_v32 }
 0x360   :  { %v633_v33 = vpop.eup %632 }
 0x361   :  { %612 = vmatmul.mubr.f32.vlgmr.msra.gmra.mxu0 %v633_v33 }
 0x421   :  { %v428_v35 = vpop.f32.mrf.mxu0 }
 0x422   :  { %v429_v36 = vadd.f32 %v457_v34, %v428_v35 }
 0x423   :  { %v613_v37 = vpop.f32.mrf.mxu0 }
 0x424   :  { %432 = vst [vmem:[#allocation8] sm:$0xff] %v429_v36 }
 0x425   :  { %705 = shalt.err (!%p702_p5)
}
 0x426   :  { %442 = dma.vmem_to_hbm [thread:$0]  %s440_s7, 128, %s901_s11, [#allocation4]  }
 0x427   :  { %718 = dma.done.wait [#allocation4], 128  }
 0x428   :  { %719 = vsyncadd [#allocation4], 4294967168 }
 0x429   :  { %446 = vsyncpa [#allocation3], 1 }
 0x42a   :  { %447 = vsyncpa [#allocation6], 1 }
 0x42b   :  { %448 = vsyncpa [#allocation4], 1 }

</bundles_post_ra>
